<compile_context>
chip_gen: v7x
topology: tpu7x:2x2x1
jax: 0.10.0
libtpu: 0.0.40
codegen_flags: <defaults>
</compile_context>

<pallas_src>
import functools

import jax
import jax.numpy as jnp
from jax.experimental import pallas as pl
from jax.experimental.pallas import tpu as pltpu


def _time_aware_conv_kernel(x_ref, w2_ref, add_ref, out_ref, xpad_ref, *, W, front):
    """One batch tile (B images) per grid step.

    x_ref   : (B, Cin, H*W)    lane-dense NCHW images (spatial flattened)
    w2_ref  : (Cout, 9*Cinp)   bf16 conv weights, K ordered (dh, dw, cin_pad)
    add_ref : (N, Cout, 1)     per-image conv bias (+ time projection), f32
    out_ref : (B, Cout, H*W)   lane-dense output tile
    xpad_ref: (Cinp, L)        flat VMEM pad scratch; image rows live at
                               [front, front+H*W); top/bottom halo rows and
                               the spare lanes around them stay zero.
    """
    B, Cin, HW = x_ref.shape
    Cout = out_ref.shape[1]
    Cinp, L = xpad_ref.shape

    # Strips-only zeroing, redone EVERY step (the interior is fully
    # overwritten per image).  Never key this on program_id == 0 while the
    # grid axis is "parallel" (v7x megacore: core 1 never runs step 0).
    xpad_ref[:, :front] = jnp.zeros((Cinp, front), jnp.float32)
    xpad_ref[:, front + HW:] = jnp.zeros((Cinp, L - front - HW), jnp.float32)
    if Cinp > Cin:
        xpad_ref[Cin:, front:front + HW] = jnp.zeros((Cinp - Cin, HW), jnp.float32)

    # Column-wrap masks for the dw=0 / dw=2 taps (hoisted out of the loops).
    lane_col = jax.lax.broadcasted_iota(jnp.int32, (Cinp, HW), 1) % W
    not_left = lane_col != 0           # kills the w == -1 wrap of dw == 0 taps
    not_right = lane_col != (W - 1)    # kills the w == W  wrap of dw == 2 taps

    step = pl.program_id(0)

    cols = []
    for b in range(B):
        # Place image b as padded rows 1..H of the flat buffer (aligned store).
        xpad_ref[:Cin, front:front + HW] = x_ref[b].astype(jnp.float32)

        taps = []
        for dh in range(3):
            for dw in range(3):
                s = front + (dh - 1) * W + (dw - 1)     # static lane offset
                tap = xpad_ref[:, s:s + HW]             # (Cinp, HW) lane window
                if dw == 0:
                    tap = jnp.where(not_left, tap, 0.0)
                elif dw == 2:
                    tap = jnp.where(not_right, tap, 0.0)
                taps.append(tap)
        cols.append(jnp.concatenate(taps, axis=0))      # (9*Cinp, HW)

    col = cols[0] if B == 1 else jnp.concatenate(cols, axis=1)   # (9*Cinp, B*HW)
    col = col.astype(jnp.bfloat16)

    # Single MXU matmul for the whole batch tile, f32 accumulate.
    acc = jnp.dot(w2_ref[...], col, preferred_element_type=jnp.float32)

    for b in range(B):
        img = step * B + b
        y = acc[:, b * HW:(b + 1) * HW] + add_ref[img]  # (Cout, HW) + (Cout, 1)
        out_ref[b] = jnp.maximum(y, 0.0).astype(out_ref.dtype)


def _pick_batch_tile(n):
    """Largest divisor of n that still leaves >= 2 grid steps (v7x megacore)."""
    if n <= 1:
        return 1
    for b in range(n // 2, 0, -1):
        if n % b == 0:
            return b
    return 1


def _round_up(x, m):
    return -(-x // m) * m


def time_aware_conv(x_nchw, params, t_emb=None, batch_tile=None):
    """Pallas implementation of TimeAwareConv.forward.

    x_nchw: (N, Cin, H, W) float32
    t_emb : (N, time_dim) float32 or None
    params: (wconv (3,3,Cin,Cout) HWIO, bconv (Cout,), wt (Td,Cout), bt (Cout,))
    returns (N, Cout, H, W) float32
    """
    wconv, bconv, wt, bt = params
    N, Cin, H, W = x_nchw.shape
    Cout = wconv.shape[-1]
    HW = H * W

    B = _pick_batch_tile(N) if batch_tile is None else batch_tile
    assert N % B == 0, "batch tile must divide batch"

    Cinp = _round_up(max(Cin, 8), 8)       # pad Cin to a full sublane tile

    # (3,3,Cin,Cout) HWIO -> (Cout, 9*Cinp) bf16, K ordered (dh, dw, cin_pad)
    # to match the in-kernel im2col ordering; the padded K columns are zero.
    w = jnp.transpose(wconv, (3, 0, 1, 2))                       # (Cout,3,3,Cin)
    w = jnp.pad(w, ((0, 0), (0, 0), (0, 0), (0, Cinp - Cin)))
    w2 = w.reshape(Cout, 9 * Cinp).astype(jnp.bfloat16)

    # Fold conv bias (+ optional time projection) into one per-image additive
    # (Cout, 1) vector; one tiny XLA matmul for the whole batch.
    add = bconv[None, :]
    if t_emb is not None:
        add = add + (t_emb @ wt + bt)          # nn.Linear: t_emb @ W^T + b
    add = jnp.broadcast_to(add, (N, Cout)).reshape(N, Cout, 1).astype(jnp.float32)

    # Lane-dense input: (N, Cin, H*W) - contiguous reshape, no extra HBM pass.
    x_flat = x_nchw.reshape(N, Cin, HW)

    # Flat pad-scratch geometry: image rows at [front, front+HW); the top
    # halo row sits just below `front`, the bottom halo just above.  `front`
    # is lane-aligned so the per-image interior store starts on a vreg lane
    # boundary.  Tap windows need front >= W + 1 and L >= front + HW + W + 1.
    front = _round_up(W + 1, 128)
    L = _round_up(front + HW + W + 1, 128)

    kernel = functools.partial(_time_aware_conv_kernel, W=W, front=front)

    out = pl.pallas_call(
        kernel,
        out_shape=jax.ShapeDtypeStruct((N, Cout, HW), x_nchw.dtype),
        grid=(N // B,),
        in_specs=[
            pl.BlockSpec((B, Cin, HW), lambda i: (i, 0, 0)),
            pl.BlockSpec((Cout, 9 * Cinp), lambda i: (0, 0)),     # fetched once
            pl.BlockSpec((N, Cout, 1), lambda i: (0, 0, 0)),      # fetched once
        ],
        out_specs=pl.BlockSpec((B, Cout, HW), lambda i: (i, 0, 0)),
        scratch_shapes=[pltpu.VMEM((Cinp, L), jnp.float32)],
        compiler_params=pltpu.CompilerParams(
            dimension_semantics=("parallel",),
        ),
    )(x_flat, w2, add)

    # (N, Cout, H*W) -> (N, Cout, H, W): contiguous, no transpose pass.
    return out.reshape(N, Cout, H, W)


def _reference(x_nchw, params, t_emb=None):
    """Pure-JAX reference matching the PyTorch semantics (verification)."""
    wconv, bconv, wt, bt = params
    y = jax.lax.conv_general_dilated(
        x_nchw, wconv, window_strides=(1, 1), padding="SAME",
        dimension_numbers=("NCHW", "HWIO", "NCHW"))
    y = y + bconv[None, :, None, None]
    if t_emb is not None:
        t = t_emb @ wt + bt
        y = y + t[:, :, None, None]
    return jnp.maximum(y, 0.0)


if __name__ == "__main__":
    N, Cin, Cout, H, W, Tdim = 2, 4, 8, 16, 16, 32

    key = jax.random.PRNGKey(0)
    kx, kt, kw, kb, kwt, kbt = jax.random.split(key, 6)
    x = jax.random.normal(kx, (N, Cin, H, W), jnp.float32)
    t_emb = jax.random.normal(kt, (N, Tdim), jnp.float32)

    # Deterministic synthetic parameters (shapes per the module's __init__).
    wconv = 0.1 * jax.random.normal(kw, (3, 3, Cin, Cout), jnp.float32)   # HWIO
    bconv = 0.1 * jax.random.normal(kb, (Cout,), jnp.float32)
    wt = 0.1 * jax.random.normal(kwt, (Tdim, Cout), jnp.float32)          # Linear W^T
    bt = 0.1 * jax.random.normal(kbt, (Cout,), jnp.float32)
    params = (wconv, bconv, wt, bt)

    out_time = time_aware_conv(x, params, t_emb)      # t_emb provided branch
    out_notime = time_aware_conv(x, params, None)     # t_emb == None branch
    jax.block_until_ready((out_time, out_notime))

    ref_time = _reference(x, params, t_emb)
    ref_notime = _reference(x, params, None)
    assert out_time.shape == (N, Cout, H, W)
    # bf16 MXU operands -> loosened tolerance vs the f32 reference.
    assert jnp.allclose(out_time, ref_time, atol=2e-2, rtol=2e-2)
    assert jnp.allclose(out_notime, ref_notime, atol=2e-2, rtol=2e-2)

    # Also exercise the batched path (B = 2 images per grid step, 2 steps).
    N2 = 4
    x2 = jax.random.normal(jax.random.PRNGKey(1), (N2, Cin, H, W), jnp.float32)
    t2 = jax.random.normal(jax.random.PRNGKey(2), (N2, Tdim), jnp.float32)
    out2 = time_aware_conv(x2, params, t2)
    jax.block_until_ready(out2)
    assert jnp.allclose(out2, _reference(x2, params, t2), atol=2e-2, rtol=2e-2)

    print("KERNEL_OK")
</pallas_src>

<mosaic_0001>
module attributes {stable_mosaic.version = 11 : i64} {
  func.func @_time_aware_conv_kernel(%arg0: i32, %arg1: memref<1x4x256xf32, #tpu.memory_space<vmem>>, %arg2: memref<8x72xbf16, #tpu.memory_space<vmem>>, %arg3: memref<2x8x1xf32, #tpu.memory_space<vmem>>, %arg4: memref<1x8x256xf32, #tpu.memory_space<vmem>>, %arg5: memref<8x512xf32, #tpu.memory_space<vmem>>) attributes {dimension_semantics = [#tpu.dimension_semantics<parallel>], iteration_bounds = array<i64: 2>, scalar_prefetch = 0 : i64, scratch_operands = 1 : i64, tpu.core_type = #tpu.core_type<tc>, window_params = [{transform_indices = @transform_0, window_bounds = array<i64: 1, 4, 256>}, {pipeline_mode = #tpu.pipeline_mode<synchronous>, transform_indices = @transform_1, window_bounds = array<i64: 8, 72>}, {pipeline_mode = #tpu.pipeline_mode<synchronous>, transform_indices = @transform_2, window_bounds = array<i64: 2, 8, 1>}, {transform_indices = @transform_3, window_bounds = array<i64: 1, 8, 256>}]} {
    %cst = arith.constant 0.000000e+00 : f32
    %0 = vector.broadcast %cst : f32 to vector<8x128xf32>
    %c0 = arith.constant 0 : index
    %c0_0 = arith.constant 0 : index
    %1 = vector.load %arg5[%c0, %c0_0] : memref<8x512xf32, #tpu.memory_space<vmem>>, vector<8x128xf32>
    tpu.vector_store %arg5[%c0, %c0_0], %0 {strides = array<i32>} : memref<8x512xf32, #tpu.memory_space<vmem>>, vector<8x128xf32>,
    %cst_1 = arith.constant 0.000000e+00 : f32
    %2 = vector.broadcast %cst_1 : f32 to vector<8x128xf32>
    %c0_2 = arith.constant 0 : index
    %c384 = arith.constant 384 : index
    %3 = vector.load %arg5[%c0_2, %c384] : memref<8x512xf32, #tpu.memory_space<vmem>>, vector<8x128xf32>
    tpu.vector_store %arg5[%c0_2, %c384], %2 {strides = array<i32>} : memref<8x512xf32, #tpu.memory_space<vmem>>, vector<8x128xf32>,
    %cst_3 = arith.constant 0.000000e+00 : f32
    %4 = vector.broadcast %cst_3 : f32 to vector<4x256xf32>
    %c4 = arith.constant 4 : index
    %c128 = arith.constant 128 : index
    %5 = vector.load %arg5[%c4, %c128] : memref<8x512xf32, #tpu.memory_space<vmem>>, vector<4x256xf32>
    tpu.vector_store %arg5[%c4, %c128], %4 {strides = array<i32>} : memref<8x512xf32, #tpu.memory_space<vmem>>, vector<4x256xf32>,
    %6 = tpu.iota {dimensions = array<i32: 1>} : vector<8x256xi32>
    %c16_i32 = arith.constant 16 : i32
    %c0_i32 = arith.constant 0 : i32
    %7 = arith.cmpi eq, %c16_i32, %c0_i32 : i32
    %c1_i32 = arith.constant 1 : i32
    %8 = arith.select %7, %c1_i32, %c16_i32 : i32
    %9 = vector.broadcast %8 : i32 to vector<8x256xi32>
    %10 = arith.remsi %6, %9 : vector<8x256xi32>
    %c0_i32_4 = arith.constant 0 : i32
    %11 = vector.broadcast %c0_i32_4 : i32 to vector<8x256xi32>
    %12 = arith.cmpi ne, %10, %11 : vector<8x256xi32>
    %c0_i32_5 = arith.constant 0 : i32
    %13 = vector.broadcast %c0_i32_5 : i32 to vector<8x256xi32>
    %14 = arith.cmpi slt, %10, %13 : vector<8x256xi32>
    %c0_i32_6 = arith.constant 0 : i32
    %15 = arith.cmpi slt, %8, %c0_i32_6 : i32
    %16 = vector.broadcast %15 : i1 to vector<8x256xi1>
    %17 = vector.broadcast %16 : vector<8x256xi1> to vector<8x256xi1>
    %18 = arith.xori %14, %17 : vector<8x256xi1>
    %19 = arith.andi %18, %12 : vector<8x256xi1>
    %20 = vector.broadcast %8 : i32 to vector<8x256xi32>
    %21 = arith.addi %10, %20 : vector<8x256xi32>
    %22 = arith.select %19, %21, %10 : vector<8x256xi1>, vector<8x256xi32>
    %c0_i32_7 = arith.constant 0 : i32
    %23 = vector.broadcast %c0_i32_7 : i32 to vector<8x256xi32>
    %24 = arith.cmpi ne, %22, %23 : vector<8x256xi32>
    %c15_i32 = arith.constant 15 : i32
    %25 = vector.broadcast %c15_i32 : i32 to vector<8x256xi32>
    %26 = arith.cmpi ne, %22, %25 : vector<8x256xi32>
    %c0_8 = arith.constant 0 : index
    %c0_9 = arith.constant 0 : index
    %c0_10 = arith.constant 0 : index
    %27 = vector.load %arg1[%c0_8, %c0_9, %c0_10] : memref<1x4x256xf32, #tpu.memory_space<vmem>>, vector<1x4x256xf32>
    %28 = vector.shape_cast %27 : vector<1x4x256xf32> to vector<4x256xf32>
    %c0_11 = arith.constant 0 : index
    %c128_12 = arith.constant 128 : index
    %29 = vector.load %arg5[%c0_11, %c128_12] : memref<8x512xf32, #tpu.memory_space<vmem>>, vector<4x256xf32>
    tpu.vector_store %arg5[%c0_11, %c128_12], %28 {strides = array<i32>} : memref<8x512xf32, #tpu.memory_space<vmem>>, vector<4x256xf32>,
    %c0_13 = arith.constant 0 : index
    %c111 = arith.constant 111 : index
    %30 = vector.load %arg5[%c0_13, %c111] : memref<8x512xf32, #tpu.memory_space<vmem>>, vector<8x256xf32>
    %cst_14 = arith.constant 0.000000e+00 : f32
    %31 = vector.broadcast %cst_14 : f32 to vector<8x256xf32>
    %32 = arith.select %24, %30, %31 : vector<8x256xi1>, vector<8x256xf32>
    %c0_15 = arith.constant 0 : index
    %c112 = arith.constant 112 : index
    %33 = vector.load %arg5[%c0_15, %c112] : memref<8x512xf32, #tpu.memory_space<vmem>>, vector<8x256xf32>
    %c0_16 = arith.constant 0 : index
    %c113 = arith.constant 113 : index
    %34 = vector.load %arg5[%c0_16, %c113] : memref<8x512xf32, #tpu.memory_space<vmem>>, vector<8x256xf32>
    %cst_17 = arith.constant 0.000000e+00 : f32
    %35 = vector.broadcast %cst_17 : f32 to vector<8x256xf32>
    %36 = arith.select %26, %34, %35 : vector<8x256xi1>, vector<8x256xf32>
    %c0_18 = arith.constant 0 : index
    %c127 = arith.constant 127 : index
    %37 = vector.load %arg5[%c0_18, %c127] : memref<8x512xf32, #tpu.memory_space<vmem>>, vector<8x256xf32>
    %cst_19 = arith.constant 0.000000e+00 : f32
    %38 = vector.broadcast %cst_19 : f32 to vector<8x256xf32>
    %39 = arith.select %24, %37, %38 : vector<8x256xi1>, vector<8x256xf32>
    %c0_20 = arith.constant 0 : index
    %c128_21 = arith.constant 128 : index
    %40 = vector.load %arg5[%c0_20, %c128_21] : memref<8x512xf32, #tpu.memory_space<vmem>>, vector<8x256xf32>
    %c0_22 = arith.constant 0 : index
    %c129 = arith.constant 129 : index
    %41 = vector.load %arg5[%c0_22, %c129] : memref<8x512xf32, #tpu.memory_space<vmem>>, vector<8x256xf32>
    %cst_23 = arith.constant 0.000000e+00 : f32
    %42 = vector.broadcast %cst_23 : f32 to vector<8x256xf32>
    %43 = arith.select %26, %41, %42 : vector<8x256xi1>, vector<8x256xf32>
    %c0_24 = arith.constant 0 : index
    %c143 = arith.constant 143 : index
    %44 = vector.load %arg5[%c0_24, %c143] : memref<8x512xf32, #tpu.memory_space<vmem>>, vector<8x256xf32>
    %cst_25 = arith.constant 0.000000e+00 : f32
    %45 = vector.broadcast %cst_25 : f32 to vector<8x256xf32>
    %46 = arith.select %24, %44, %45 : vector<8x256xi1>, vector<8x256xf32>
    %c0_26 = arith.constant 0 : index
    %c144 = arith.constant 144 : index
    %47 = vector.load %arg5[%c0_26, %c144] : memref<8x512xf32, #tpu.memory_space<vmem>>, vector<8x256xf32>
    %c0_27 = arith.constant 0 : index
    %c145 = arith.constant 145 : index
    %48 = vector.load %arg5[%c0_27, %c145] : memref<8x512xf32, #tpu.memory_space<vmem>>, vector<8x256xf32>
    %cst_28 = arith.constant 0.000000e+00 : f32
    %49 = vector.broadcast %cst_28 : f32 to vector<8x256xf32>
    %50 = arith.select %26, %48, %49 : vector<8x256xi1>, vector<8x256xf32>
    %51 = tpu.concatenate %32, %33, %36, %39, %40, %43, %46, %47, %50 in 0 : vector<8x256xf32>, vector<8x256xf32>, vector<8x256xf32>, vector<8x256xf32>, vector<8x256xf32>, vector<8x256xf32>, vector<8x256xf32>, vector<8x256xf32>, vector<8x256xf32> -> vector<72x256xf32>
    %52 = arith.truncf %51 : vector<72x256xf32> to vector<72x256xbf16>
    %c0_29 = arith.constant 0 : index
    %c0_30 = arith.constant 0 : index
    %53 = vector.load %arg2[%c0_29, %c0_30] : memref<8x72xbf16, #tpu.memory_space<vmem>>, vector<8x72xbf16>
    %cst_31 = arith.constant dense<0.000000e+00> : vector<8x256xf32>
    %54 = tpu.matmul %53, %52, %cst_31 {dimension_numbers = #tpu.dot_dimension_numbers<[1], [0], [0], [1], [0, 0, 1, 1], [], []>} : vector<8x72xbf16>, vector<72x256xbf16>, vector<8x256xf32> -> vector<8x256xf32>
    %c1_i32_32 = arith.constant 1 : i32
    %55 = arith.muli %arg0, %c1_i32_32 : i32
    %c0_i32_33 = arith.constant 0 : i32
    %56 = arith.addi %55, %c0_i32_33 : i32
    %57 = arith.index_cast %56 : i32 to index
    %c0_34 = arith.constant 0 : index
    %c0_35 = arith.constant 0 : index
    %58 = vector.load %arg3[%57, %c0_34, %c0_35] : memref<2x8x1xf32, #tpu.memory_space<vmem>>, vector<1x8x1xf32>
    %59 = vector.shape_cast %58 : vector<1x8x1xf32> to vector<8x1xf32>
    %60 = vector.broadcast %59 : vector<8x1xf32> to vector<8x256xf32>
    %61 = arith.addf %54, %60 : vector<8x256xf32>
    %cst_36 = arith.constant 0.000000e+00 : f32
    %62 = vector.broadcast %cst_36 : f32 to vector<8x256xf32>
    %63 = arith.maximumf %61, %62 : vector<8x256xf32>
    %c0_37 = arith.constant 0 : index
    %c0_38 = arith.constant 0 : index
    %c0_39 = arith.constant 0 : index
    %64 = vector.load %arg4[%c0_37, %c0_38, %c0_39] : memref<1x8x256xf32, #tpu.memory_space<vmem>>, vector<1x8x256xf32>
    %65 = vector.shape_cast %64 : vector<1x8x256xf32> to vector<8x256xf32>
    %66 = vector.shape_cast %63 : vector<8x256xf32> to vector<1x8x256xf32>
    tpu.vector_store %arg4[%c0_37, %c0_38, %c0_39], %66 {strides = array<i32>} : memref<1x8x256xf32, #tpu.memory_space<vmem>>, vector<1x8x256xf32>,
    return
  }
  func.func @transform_0(%arg0: i32) -> (i32, i32, i32) {
    %c0_i32 = arith.constant 0 : i32
    %c0_i32_0 = arith.constant 0 : i32
    %c0_i32_1 = arith.constant 0 : i32
    return %arg0, %c0_i32, %c0_i32_0 : i32, i32, i32
  }
  func.func @transform_1(%arg0: i32) -> (i32, i32) {
    %c0_i32 = arith.constant 0 : i32
    %c0_i32_0 = arith.constant 0 : i32
    %c0_i32_1 = arith.constant 0 : i32
    return %c0_i32, %c0_i32_0 : i32, i32
  }
  func.func @transform_2(%arg0: i32) -> (i32, i32, i32) {
    %c0_i32 = arith.constant 0 : i32
    %c0_i32_0 = arith.constant 0 : i32
    %c0_i32_1 = arith.constant 0 : i32
    %c0_i32_2 = arith.constant 0 : i32
    return %c0_i32, %c0_i32_0, %c0_i32_1 : i32, i32, i32
  }
  func.func @transform_3(%arg0: i32) -> (i32, i32, i32) {
    %c0_i32 = arith.constant 0 : i32
    %c0_i32_0 = arith.constant 0 : i32
    %c0_i32_1 = arith.constant 0 : i32
    return %arg0, %c0_i32, %c0_i32_0 : i32, i32, i32
  }
}

</mosaic_0001>

<bundles_post_ra>
// kernel: tpu_custom_call.1
= control target key start
LH: loop header
LB: loop body
LE: loop exit
PB: predicated region body
PF: predicated region fallthrough
CT: control target
= control target key end

     0   :  { %8 = vsyncpa [#allocation4], 0  ;;  %s882_s0 = inlined_call_operand.vmem [shape: f32[2,4,256], index: 0, kind: input, shape index: {}]   ;;  %s883_s1 = inlined_call_operand.vmem [shape: bf16[8,72], index: 1, kind: input, shape index: {}]   ;;  %s884_s2 = inlined_call_operand.vmem [shape: f32[2,8,1], index: 2, kind: input, shape index: {}]   ;;  %s885_s3 = inlined_call_operand.hbm [shape: f32[2,8,256], index: 3, kind: output, shape index: {}]  }
   0x1   :  { %10 = vsyncpa [#allocation4 + $0x1], 0  ;;  %s703_s12 = smov 0   ;;  %s705_s13 = smov 0  }
   0x2   :  { %s707_s14 = smov 0   ;;  %s709_s15 = smov 0  }
   0x3 LB: > { %s724_s16 = sadd.s32 4294967295, %s669_s15   ;;  %s474_s17 = sadd.s32 4294967294, %s669_s15   ;;  %s669_s15 = sphi %s709_s15, %s903_s15   ;;  %s665_s14 = sphi %s707_s14, %s902_s14   ;;  %s661_s13 = sphi %s705_s13, %s901_s13   ;;  %s657_s12 = sphi %s703_s12, %s900_s12  }
   0x4   : > { %s728_s18 = sadd.s32 1, %s669_s15   ;;  %s91_s19 = sadd.s32 1, %s665_s14 }
   0x5   : > { %s88_s20 = ssub.s32 %s669_s15, %s728_s18  ;;  %p101_p0 = scmp.ne.s32.totalorder %s665_s14, %s661_s13 }
   0x6   : > { %p89_p1 = scmp.eq.s32.totalorder %s88_s20, 0  ;;  %p102_p2 = scmp.eq.s32.totalorder %s724_s16, 1 }
   0x7   : > { %p107_p3 = scmp.ne.s32.totalorder %s661_s13, %s657_s12  ;;  %p108_p4 = scmp.eq.s32.totalorder %s474_s17, 1 }
   0x8   : > { %s739_s21 = scalar_select %p89_p1, %s665_s14, %s91_s19  }
   0x9   : > { %p741_p5 = por %p102_p2, %p101_p0  ;;  %p745_p6 = por %p108_p4, %p107_p3 }
   0xa   : > { %p477_p7 = scmp.ge.s32.totalorder %s669_s15, 1  ;;  %p140_p8 = scmp.lt.s32.totalorder %s669_s15, 3 }
   0xc   : > { %p141_p9 = pnand %p477_p7, %p140_p8 }
   0xd   : > { %v671_v0 = vmov (!%p141_p9), 0.0   ;;  %s672_s24 = smov (!%p141_p9), 17   ;;  %s673_s25 = smov (!%p141_p9), 15   ;;  %v680_v7 = vmov (!%p141_p9), 0   ;;  %v174_v11 = vlaneseq (!%p141_p9)  ;;  %vm223_vm1 = vcmask (!%p141_p9), 138240  }
   0xe   : > { %144 = sbr.rel (%p141_p9) target bundleno = 418 (0x1a2), region = 32  ;;  %217 = vrot.lane.b32.xlu1 (!%p141_p9), %v671_v0, %s672_s24  ;;  %172 = vst [vmem:[#allocation2 + $0x8] sm:$0xf0] (!%p141_p9), %v671_v0  ;;  %173 = vst [vmem:[#allocation2 + $0x10] sm:$0xf0] (!%p141_p9), %v671_v0  ;;  %230 = vrot.lane.b32.xlu0 (!%p141_p9), %v671_v0, %s673_s25  ;;  %p164_p10 = scmp.lt.s32.totalorder (!%p141_p9), %s724_s16, 1 }
   0xf   : > { %s674_s27 = smov (!%p141_p9), 16   ;;  %s675_s5 = smov (!%p141_p9), 1   ;;  %385 = vmatprep.mubr.bf16.mxu0 (!%p141_p9), %v680_v7  ;;  %605 = vset.pattern.permute.xlu0 (!%p141_p9), %v680_v7  ;;  %v175_v13 = vand.u32 (!%p141_p9), 127, %v174_v11  ;;  %vm307_vm2 = vcmask (!%p141_p9), 130048   ;;  %vm249_vm4 = vcmask (!%p141_p9), 7168   ;;  %vm681_vm5 = vmmov (!%p141_p9), 1  }
  0x10   : > { %s676_s6 = smov (!%p141_p9), 127   ;;  %s677_s7 = smov (!%p141_p9), 112   ;;  %vm236_vm7 = vcmask (!%p141_p9), 121856   ;;  %vm268_vm12 = vcmask (!%p141_p9), 1039360   ;;  %vm318_vm14 = vcmask (!%p141_p9), 916480  }
  0x11   : > { %s678_s8 = smov (!%p141_p9), 111   ;;  %s679_s9 = smov (!%p141_p9), 113   ;;  %v176_v15 = vadd.s32 (!%p141_p9), 128, %v175_v13  ;;  %v181_v19 = vand.u32 (!%p141_p9), 15, %v175_v13 }
  0x12   : > { %301 = vrot.lane.b32.xlu1 (!%p141_p9), %v671_v0, %s674_s27  ;;  %s481_s10 = sshll.u32 (!%p141_p9), %s724_s16, 3 }
  0x13   : > { %s335_s19 = scalar_lea.vmem (!%p141_p9), %s884_s2, %s481_s10  ;;  %v188_v18 = vand.u32 (!%p141_p9), 15, %v176_v15  ;;  %vm774_vm3 = vcmp.ne.s32.totalorder (!%p141_p9), %v181_v19, 0  ;;  %vm797_vm10 = vcmp.ne.s32.totalorder (!%p141_p9), %v181_v19, 15 }
  0x14   : > { %v336_v8 = vld [vmem:[%s335_s19] sm:$0xff] (!%p141_p9)  ;;  %vm792_vm9 = vmpackc.low (!%p141_p9), %vm681_vm5, %vm774_vm3 }
  0x15   : > { %s165_s26 = scalar_select %p164_p10, %s724_s16, 1  ;;  %vm770_vm0 = vcmp.ne.s32.totalorder %v188_v18, 0  ;;  %vm785_vm8 = vcmp.ne.s32.totalorder %v188_v18, 15  ;;  %vm491_vm13 = vmpackc.low %vm774_vm3, %vm797_vm10  ;;  %vm346_vm3 = vcmask 1043456  }
  0x16   : > { %243 = vrot.lane.b32.xlu1 %v671_v0, %s675_s5  ;;  %vm781_vm6 = vmpackc.low %vm681_vm5, %vm770_vm0 }
  0x17   : > { %s513_s28 = sshll.u32 %s165_s26, 3  ;;  %vm488_vm11 = vmpackc.low %vm770_vm0, %vm785_vm8 }
  0x18   : > { %s168_s4 = scalar_lea.vmem %s882_s0, %s513_s28  ;;  %vm494_vm15 = vmpackc.low %vm785_vm8, %vm681_vm5 }
  0x19   : > { %v205_v1 = vld [vmem:[%s168_s4] sm:$0xff]  ;;  %vm497_vm0 = vmpackc.low %vm797_vm10, %vm681_vm5 }
  0x1a   : > { %v207_v2 = vcombine.high %v205_v1, %v205_v1  ;;  %209 = vst [vmem:[#allocation2 + $0x8] sm:$0xf] %v205_v1 }
  0x1c   : > { %210 = vst [vmem:[#allocation2 + $0x10] sm:$0xf] %v207_v2 }
  0x21   : > { %v756_v3 = vld [vmem:[#allocation2 + $0x8] sm:$0xff] }
  0x22   : > { %262 = vrot.lane.b32.xlu1 %v756_v3, %s676_s6 }
  0x23   : > { %v759_v4 = vld [vmem:[#allocation2 + $0x10] sm:$0xff] }
  0x24   : > { %v565_v5 = vpack.i.bf16 %v759_v4, %v756_v3  ;;  %v585_v6 = vpack.i.bf16 %v671_v0, %v759_v4 }
  0x26   : > { %566 = vrot.lane.b32.xlu0 %v565_v5, %s672_s24  ;;  %581 = vrot.lane.b32.xlu1 %v565_v5, %s675_s5 }
  0x2a   : > { %571 = vrot.lane.b32.xlu0 %v565_v5, %s674_s27  ;;  %596 = vrot.lane.b32.xlu1 %v585_v6, %s677_s7  ;;  %s514_s27 = sshll.u32 %s724_s16, 8 }
  0x2b   : > { %s840_s5 = scalar_lea.hbm %s885_s3, %s514_s27 }
  0x2e   : > { %576 = vrot.lane.b32.xlu0 %v565_v5, %s673_s25  ;;  %312 = vrot.lane.b32.xlu1 %v756_v3, %s677_s7  ;;  %s161_s25 = sand.u32 1, %s661_s13   ;;  %s682_s7 = smov [#allocation3]  }
  0x2f   : > { %s478_s26 = sshll.u32 %s161_s25, 4  ;;  %s399_s16 = scalar_lea.sflag [#allocation4], %s161_s25 }
  0x30   : > { %s163_s28 = scalar_lea.vmem [#allocation3], %s478_s26 }
  0x31   : > { %s413_s29 = sshll.u32 %s163_s28, 4  ;;  %s842_s29 = int_to_ptr.vmem [resolvable:$true] %s413_s29 }
  0x32   : > { %586 = vrot.lane.b32.xlu0 %v585_v6, %s676_s6  ;;  %292 = vrot.lane.b32.xlu1 %v671_v0, %s678_s8  ;;  %s607_s6 = scalar_lea.vmem %s842_s29, 256 }
  0x33   : > { %p608_p11 = scmp.ne.s32.totalorder %s842_s29, %s607_s6 }
  0x35   : > { %p609_p12 = pnand %p608_p11, %p741_p5 }
  0x36   : > { %591 = vrot.lane.b32.xlu0 %v585_v6, %s679_s9 }
  0x37   : > { %p610_p13 = pneg %p609_p12 }
  0x3a   : > { %275 = vrot.lane.b32.xlu0 %v756_v3, %s679_s9 }
  0x3e   : > { %601 = vrot.lane.b32.xlu0 %v565_v5, %s678_s8  ;;  %s611_s8 = sshll.u32 %s682_s7, 4  ;;  %s612_s8 = int_to_ptr.vmem [resolvable:$false] %s611_s8 }
  0x3f   : > { %s613_s9 = scalar_lea.vmem %s612_s8, 512  ;;  %p614_p0 = scmp.lt.s32.totalorder %s842_s29, %s612_s8 }
  0x40   : > { %p615_p1 = scmp.lt.s32.totalorder %s613_s9, %s607_s6 }
  0x42   : > { %339 = vperm.xlu0 %605, %v336_v8   ;;  %p616_p2 = por %p615_p1, %p614_p0 }
  0x44   : > { %p617_p3 = pnand %p616_p2, %p610_p13 }
  0x80   : > { %v218_v9 = vpop.permute.xlu1 %217  ;;  %v231_v14 = vpop.permute.xlu0 %230 }
  0x84   : > { %v302_v10 = vpop.permute.xlu1 %301 }
  0x88   : > { %v244_v12 = vpop.permute.xlu1 %243 }
  0x94   : > { %v263_v16 = vpop.permute.xlu1 %262 }
  0x98   : > { %v567_v17 = vpop.permute.xlu0 %566  ;;  %v582_v22 = vpop.permute.xlu1 %581 }
  0x99   : > { %v569_v20 = vunpack.i.h.bf16 %v567_v17  ;;  %v568_v21 = vunpack.i.l.bf16 %v567_v17  ;;  %v584_v27 = vunpack.i.h.bf16 %v582_v22  ;;  %v583_v29 = vunpack.i.l.bf16 %v582_v22  ;;  %v333_v17 = vld [vmem:[%s883_s1] sm:$0xf] }
  0x9b   : > { %v225_v30 = vsel %vm223_vm1, %v568_v21, %v569_v20  ;;  %v224_v33 = vsel %vm223_vm1, %v218_v9, %v568_v21  ;;  %v251_v40 = vsel %vm249_vm4, %v583_v29, %v584_v27  ;;  %v250_v45 = vsel %vm249_vm4, %v244_v12, %v583_v29 }
  0x9c   : > { %v572_v23 = vpop.permute.xlu0 %571  ;;  %v597_v44 = vpop.permute.xlu1 %596  ;;  %vm281_vm1 = vcmask 924672   ;;  %vm342_vm4 = vcmask 588800  }
  0x9d   : > { %v574_v25 = vunpack.i.h.bf16 %v572_v23  ;;  %v573_v26 = vunpack.i.l.bf16 %v572_v23  ;;  %v599_v53 = vunpack.i.h.bf16 %v597_v44  ;;  %v598_v54 = vunpack.i.l.bf16 %v597_v44 }
  0x9f   : > { %v309_v31 = vsel %vm307_vm2, %v573_v26, %v574_v25  ;;  %v308_v34 = vsel %vm307_vm2, %v302_v10, %v573_v26  ;;  %v320_v63 = vsel %vm318_vm14, %v598_v54, %v599_v53  ;;  %vm294_vm2 = vcmask 908288  }
  0xa0   : > { %v577_v35 = vpop.permute.xlu0 %576  ;;  %v483_v37 = vpack.c.bf16 %v309_v31, %v225_v30  ;;  %v486_v39 = vpack.c.bf16 %v308_v34, %v224_v33  ;;  %v313_v60 = vpop.permute.xlu1 %312 }
  0xa1   : > { %v579_v41 = vunpack.i.h.bf16 %v577_v35  ;;  %v578_v42 = vunpack.i.l.bf16 %v577_v35  ;;  %v319_v0 = vsel %vm318_vm14, %v313_v60, %v598_v54 }
  0xa2   : > { %484 = vmatprep.subr.msk.bf16.mxu0 %vm781_vm6, %v483_v37 }
  0xa3   : > { %v237_v46 = vsel %vm236_vm7, %v231_v14, %v578_v42  ;;  %v238_v47 = vsel %vm236_vm7, %v578_v42, %v579_v41  ;;  %487 = vmatpush1.bf16.msk.msra.mxu0 %vm792_vm9, %v486_v39 }
  0xa4   : > { %v489_v48 = vpack.c.bf16 %v251_v40, %v238_v47  ;;  %v492_v49 = vpack.c.bf16 %v250_v45, %v237_v46  ;;  %v587_v50 = vpop.permute.xlu0 %586  ;;  %v293_v7 = vpop.permute.xlu1 %292 }
  0xa5   : > { %v589_v51 = vunpack.i.h.bf16 %v587_v50  ;;  %v588_v52 = vunpack.i.l.bf16 %v587_v50 }
  0xa6   : > { %490 = vmatprep.subr.msk.bf16.mxu0 %vm488_vm11, %v489_v48 }
  0xa7   : > { %v269_v55 = vsel %vm268_vm12, %v263_v16, %v588_v52  ;;  %v270_v56 = vsel %vm268_vm12, %v588_v52, %v589_v51  ;;  %493 = vmatpush1.bf16.msk.msra.mxu0 %vm491_vm13, %v492_v49 }
  0xa8   : > { %v495_v57 = vpack.c.bf16 %v270_v56, %v759_v4  ;;  %v498_v58 = vpack.c.bf16 %v269_v55, %v756_v3  ;;  %v592_v59 = vpop.permute.xlu0 %591 }
  0xa9   : > { %v594_v61 = vunpack.i.h.bf16 %v592_v59  ;;  %v593_v62 = vunpack.i.l.bf16 %v592_v59 }
  0xaa   : > { %496 = vmatprep.subr.msk.bf16.mxu0 %vm494_vm15, %v495_v57 }
  0xab   : > { %499 = vmatpush1.bf16.msk.msra.mxu0 %vm497_vm0, %v498_v58  ;;  %v283_v1 = vsel %vm281_vm1, %v593_v62, %v594_v61 }
  0xac   : > { %v276_v2 = vpop.permute.xlu0 %275  ;;  %v501_v4 = vpack.c.bf16 %v320_v63, %v283_v1 }
  0xad   : > { %v282_v5 = vsel %vm281_vm1, %v276_v2, %v593_v62 }
  0xae   : > { %v504_v3 = vpack.c.bf16 %v319_v0, %v282_v5  ;;  %502 = vmatprep.subr.msk.bf16.mxu0 %vm781_vm6, %v501_v4 }
  0xb0   : > { %v602_v6 = vpop.permute.xlu0 %601  ;;  %505 = vmatpush1.bf16.msk.msra.mxu0 %vm792_vm9, %v504_v3 }
  0xb1   : > { %v604_v8 = vunpack.i.h.bf16 %v602_v6  ;;  %v603_v9 = vunpack.i.l.bf16 %v602_v6 }
  0xb3   : > { %v296_v10 = vsel %vm294_vm2, %v604_v8, %v293_v7  ;;  %v295_v11 = vsel %vm294_vm2, %v603_v9, %v604_v8 }
  0xb4   : > { %v300_v12 = vsel %vm785_vm8, %v296_v10, 0.0  ;;  %v299_v13 = vsel %vm797_vm10, %v295_v11, 0.0 }
  0xb5   : > { %v332_v14 = vpack.c.bf16 %v300_v12, %v300_v12  ;;  %v331_v15 = vpack.c.bf16 %v299_v13, %v299_v13 }
  0xb7   : > { %506 = vmatprep.subr.msk.bf16.mxu0 %vm346_vm3, %v332_v14  ;;  %v348_v16 = vsel %vm346_vm3, %v331_v15, 0 }
  0xb8   : > { %362 = vmatpush1.bf16.msra.mxu0 %v348_v16 }
  0xbb   : > { %507 = vmatmul.mubr.msk.bf16.vlgmr.msra.gmra.mrb[0].mxu0 %vm342_vm4, %v333_v17 }
  0xc1   : > { %v340_v18 = vpop.permute.xlu0 %339 }
 0x18e   : > { %v387_v19 = vpop.f32.mrb[0].mxu0 }
 0x18f   : > { %v388_v20 = vadd.f32 %v387_v19, %v340_v18  ;;  %v389_v21 = vpop.f32.mrb[1].mxu0 }
 0x190   : > { %v390_v22 = vadd.f32 %v389_v21, %v340_v18  ;;  %v391_v23 = vpop.f32.mrb[2].mxu0 }
 0x191   : > { %v394_v24 = vmax.f32 %v388_v20, 0.0  ;;  %v392_v25 = vpop.f32.mrb[3].mxu0 }
 0x192   : > { %v395_v26 = vmax.f32 %v390_v22, 0.0 }
 0x193   : > { %396 = vst [vmem:[%s163_s28] sm:$0xff] %v394_v24 }
 0x194   : > { %397 = vst [vmem:[%s163_s28 + $0x8] sm:$0xff] %v395_v26 }
 0x195   : > { %620 = shalt.err (!%p617_p3)
}
 0x196   : > { %s621_s10 = scalar_lea.hbm %s840_s5, 256  ;;  %s625_s19 = scalar_lea.hbm %s885_s3, 512 }
 0x197   : > { %p622_p4 = scmp.ne.s32.totalorder %s840_s5, %s621_s10  ;;  %p626_p9 = scmp.lt.u32.totalorder %s840_s5, %s885_s3 }
 0x198   : > { %p627_p10 = scmp.lt.u32.totalorder %s625_s19, %s621_s10  ;;  %p629_p12 = scmp.lt.u32.totalorder %s621_s10, %s840_s5 }
 0x199   : > { %p623_p7 = pnand %p622_p4, %p741_p5 }
 0x19a   : > { %p628_p11 = por %p627_p10, %p626_p9 }
 0x19b   : > { %p624_p8 = pneg %p623_p7 }
 0x19c   : > { %p630_p13 = por %p629_p12, %p628_p11 }
 0x19e   : > { %p631_p0 = pnand %p630_p13, %p624_p8 }
 0x1a0   : > { %634 = shalt.err (!%p631_p0)
}
 0x1a1   : > { %515 = dma.vmem_to_hbm [thread:$0]  (%p741_p5), %s842_s29, 256, %s840_s5, %s399_s16  }
 0x1a2 PF: > { %p521_p1 = scmp.ge.s32.totalorder %s669_s15, 2  ;;  %s425_s25 = sand.u32 1, %s657_s12  }
 0x1a3   : > { %s426_s26 = scalar_lea.sflag [#allocation4], %s425_s25 }
 0x1a4   : > { %p518_p2 = pnand %p521_p1, %p745_p6 }
 0x1a6   : > { %652 = dma.done.wait (!%p518_p2), %s426_s26, 256  }
 0x1a7   : > { %654 = vsyncadd (!%p518_p2), %s426_s26, 4294967040  ;;  %p13_p3 = scmp.ge.s32.totalorder %s728_s18, 4   ;;  %s900_s12 = smov %s661_s13 }
 0x1a8   : > { %s901_s13 = smov %s665_s14  ;;  %s902_s14 = smov %s739_s21 }
 0x1a9   : > { %s903_s15 = smov %s728_s18  ;;  %15 = sbr.rel (!%p13_p3) target bundleno = 3 (0x3), region = 68 }
 0x1b0   :  { %431 = vsyncpa [#allocation4], 1 }
 0x1b1   :  { %433 = vsyncpa [#allocation4 + $0x1], 1 }

</bundles_post_ra>
